<compile_context>
chip_gen: v5e
topology: v5e:2x2
jax: 0.10.0
libtpu: 0.0.40
codegen_flags: <defaults>
</compile_context>

<pallas_src>
import jax
import jax.numpy as jnp
from jax.experimental import pallas as pl
from jax.experimental.pallas import tpu as pltpu

EPS = 1e-5


# --------------------------------------------------------------------------
# Kernels
# --------------------------------------------------------------------------
def _bn_fused_kernel(x_ref, gamma_ref, beta_ref, o_ref):
    # x_ref:     (N, c_tile, HW) -- the full per-channel slab for this block
    # gamma_ref: (c_tile, 1) f32
    # beta_ref:  (c_tile, 1) f32
    x = x_ref[...]
    count = x.shape[0] * x.shape[2]

    # Single reduction pass, f32 accumulation (one read of the tile).
    xf = x.astype(jnp.float32)
    s = jnp.sum(xf, axis=(0, 2), keepdims=True)            # (1, c_tile, 1)
    ss = jnp.sum(xf * xf, axis=(0, 2), keepdims=True)      # (1, c_tile, 1)
    mean = s * (1.0 / count)
    var = jnp.maximum(ss * (1.0 / count) - mean * mean, 0.0)   # biased, like BN2d
    inv_std = jax.lax.rsqrt(var + EPS)

    # Fold affine into per-channel scale/shift: y = x*scale + shift.
    scale = gamma_ref[...][None, :, :] * inv_std            # (1, c_tile, 1)
    shift = beta_ref[...][None, :, :] - mean * scale

    if x.dtype == jnp.bfloat16:
        # v6e/v7x VPUs are bf16-native: apply the folded MAD on the native
        # tile (halves vreg traffic, no f32 working copy on the store path).
        o_ref[...] = x * scale.astype(jnp.bfloat16) + shift.astype(jnp.bfloat16)
    else:
        o_ref[...] = (xf * scale + shift).astype(o_ref.dtype)


def _bn_stats_kernel(x_ref, sum_ref, sumsq_ref):
    # Split-grid fallback, pass 1: accumulate per-channel sum / sum-of-squares.
    # Output blocks are resident across the (innermost) reduction axes.
    @pl.when(jnp.logical_and(pl.program_id(1) == 0, pl.program_id(2) == 0))
    def _():
        sum_ref[...] = jnp.zeros_like(sum_ref)
        sumsq_ref[...] = jnp.zeros_like(sumsq_ref)

    xf = x_ref[...].astype(jnp.float32)                      # (n_t, c_t, hw_t)
    sum_ref[...] += jnp.sum(xf, axis=(0, 2))[:, None]
    sumsq_ref[...] += jnp.sum(xf * xf, axis=(0, 2))[:, None]


def _bn_apply_kernel(x_ref, scale_ref, shift_ref, o_ref):
    # Split-grid fallback, pass 2: y = x*scale + shift (elementwise).
    x = x_ref[...]
    scale = scale_ref[...][None, :, :]
    shift = shift_ref[...][None, :, :]
    if x.dtype == jnp.bfloat16:
        o_ref[...] = x * scale.astype(jnp.bfloat16) + shift.astype(jnp.bfloat16)
    else:
        o_ref[...] = (x.astype(jnp.float32) * scale + shift).astype(o_ref.dtype)


# --------------------------------------------------------------------------
# Tiling / VMEM heuristics (generation-aware)
# --------------------------------------------------------------------------
def _vmem_capacity_bytes():
    try:
        info = pltpu.get_tpu_info()
        cap = getattr(info, "vmem_capacity_bytes", None)
        if cap:
            return int(cap)
    except Exception:
        pass
    return 64 << 20  # conservative default (v7x per-core VMEM)


def _vmem_params():
    cap = _vmem_capacity_bytes()
    budget = int(0.70 * cap)                    # working-set target per grid step
    ceiling = max(cap - (8 << 20), 32 << 20)    # headroom for internal scratch/sems
    return budget, ceiling


def _per_elem_vmem_bytes(itemsize):
    # 2x double-buffered input + 2x double-buffered output (native dtype)
    # + ~2 full-tile f32 temporaries (cast copy / x*x) during the reduction.
    return 4 * itemsize + 8


def _choose_c_tile(N, C, HW, itemsize, budget_bytes, min_blocks=4):
    """Channel-block size for the fused path, or None if even the smallest
    legal channel slab exceeds the VMEM working budget."""
    per_elem = _per_elem_vmem_bytes(itemsize)
    # dtype-aware sublane packing: 8 rows for 4-byte, 16 for 2-byte, 32 for 1-byte.
    step = 8 * max(1, 4 // itemsize)
    cands = {d for d in range(step, C + 1, step) if C % d == 0}
    if not cands and step != 8:
        cands = {d for d in range(8, C + 1, 8) if C % d == 0}
    cands.add(C)  # full dim is always a legal second-to-last block size
    fitting = sorted(d for d in cands if N * d * HW * per_elem <= budget_bytes)
    if not fitting:
        return None
    # Prefer an even grid depth >= min_blocks: keeps the BlockSpec pipeline
    # busy and (on v7x) splits the "parallel" channel axis over both cores.
    for pred in (
        lambda d: C // d >= min_blocks and (C // d) % 2 == 0,
        lambda d: C // d >= min_blocks,
        lambda d: C // d >= 2 and (C // d) % 2 == 0,
        lambda d: True,
    ):
        sel = [d for d in fitting if pred(d)]
        if sel:
            return max(sel)
    return max(fitting)


def _choose_split_tiles(N, C, HW, per_elem, budget_bytes):
    """Block sizes (c_tile, n_tile, hw_tile) for the split fallback."""
    c_cands = sorted({d for d in range(8, C + 1, 8) if C % d == 0} | {C})
    n_cands = sorted(d for d in range(1, N + 1) if N % d == 0)
    hw_cands = sorted({d for d in range(128, HW + 1, 128) if HW % d == 0} | {HW})
    best_key, best = None, None
    for ct in c_cands:
        for nt in n_cands:
            for ht in hw_cands:
                b = ct * nt * ht * per_elem
                if b <= budget_bytes:
                    key = (b, ht, nt)          # largest block, lane-densest first
                    if best_key is None or key > best_key:
                        best_key, best = key, (ct, nt, ht)
    if best is None:
        # TODO(synk): extreme N*HW where even the minimal legal block exceeds
        # the working budget; take the smallest legal block and rely on the
        # vmem ceiling (may spill, but stays correct).
        return min(c_cands), min(n_cands), min(hw_cands)
    return best


# --------------------------------------------------------------------------
# pallas_call wrappers
# --------------------------------------------------------------------------
def _bn_fused(x3, gamma2, beta2, c_tile, per_elem, ceiling):
    N, C, HW = x3.shape
    itemsize = jnp.dtype(x3.dtype).itemsize
    num_c_blocks = C // c_tile

    vmem_est = N * c_tile * HW * per_elem + (1 << 20)
    vmem_limit = int(min(max(vmem_est, 32 << 20), ceiling))

    cost = pl.CostEstimate(
        flops=7 * N * C * HW,
        transcendentals=C,
        bytes_accessed=2 * N * C * HW * itemsize + 2 * C * 4,
    )

    return pl.pallas_call(
        _bn_fused_kernel,
        out_shape=jax.ShapeDtypeStruct((N, C, HW), x3.dtype),
        grid=(num_c_blocks,),
        in_specs=[
            pl.BlockSpec((N, c_tile, HW), lambda c: (0, c, 0)),
            pl.BlockSpec((c_tile, 1), lambda c: (c, 0)),
            pl.BlockSpec((c_tile, 1), lambda c: (c, 0)),
        ],
        out_specs=pl.BlockSpec((N, c_tile, HW), lambda c: (0, c, 0)),
        compiler_params=pltpu.CompilerParams(
            dimension_semantics=("parallel",),
            vmem_limit_bytes=vmem_limit,
        ),
        cost_estimate=cost,
    )(x3, gamma2, beta2)


def _bn_split(x3, gamma2, beta2, budget, ceiling, per_elem):
    """Two-pass fallback for shapes whose per-channel slab cannot fit VMEM."""
    N, C, HW = x3.shape
    c_tile, n_tile, hw_tile = _choose_split_tiles(N, C, HW, per_elem, budget)
    grid = (C // c_tile, N // n_tile, HW // hw_tile)

    vmem_est = n_tile * c_tile * hw_tile * per_elem + (1 << 20)
    vmem_limit = int(min(max(vmem_est, 32 << 20), ceiling))

    x_spec = pl.BlockSpec((n_tile, c_tile, hw_tile), lambda c, n, s: (n, c, s))
    cvec_spec = pl.BlockSpec((c_tile, 1), lambda c, n, s: (c, 0))

    # Pass 1: per-channel sum / sum-of-squares (reduction axes innermost).
    sums, sumsqs = pl.pallas_call(
        _bn_stats_kernel,
        out_shape=(jax.ShapeDtypeStruct((C, 1), jnp.float32),
                   jax.ShapeDtypeStruct((C, 1), jnp.float32)),
        grid=grid,
        in_specs=[x_spec],
        out_specs=(cvec_spec, cvec_spec),
        compiler_params=pltpu.CompilerParams(
            dimension_semantics=("parallel", "arbitrary", "arbitrary"),
            vmem_limit_bytes=vmem_limit,
        ),
    )(x3)

    count = N * HW
    mean = sums / count
    var = jnp.maximum(sumsqs / count - mean * mean, 0.0)
    inv_std = jax.lax.rsqrt(var + EPS)
    scale = gamma2 * inv_std                  # (C, 1)
    shift = beta2 - mean * scale              # (C, 1)

    # Pass 2: normalize (elementwise, fully pipelined).
    return pl.pallas_call(
        _bn_apply_kernel,
        out_shape=jax.ShapeDtypeStruct((N, C, HW), x3.dtype),
        grid=grid,
        in_specs=[x_spec, cvec_spec, cvec_spec],
        out_specs=x_spec,
        compiler_params=pltpu.CompilerParams(
            dimension_semantics=("parallel", "parallel", "arbitrary"),
            vmem_limit_bytes=vmem_limit,
        ),
    )(x3, scale, shift)


def _batchnorm2d_xla(x_nchw, gamma, beta):
    """Plain-XLA path for tiny spatial extents (HW < 128): the Pallas block
    layout would be mostly lane padding + masked stores there."""
    xf = x_nchw.astype(jnp.float32)
    mean = jnp.mean(xf, axis=(0, 2, 3), keepdims=True)
    var = jnp.mean((xf - mean) ** 2, axis=(0, 2, 3), keepdims=True)
    g = gamma.reshape(1, -1, 1, 1).astype(jnp.float32)
    b = beta.reshape(1, -1, 1, 1).astype(jnp.float32)
    return ((xf - mean) * jax.lax.rsqrt(var + EPS) * g + b).astype(x_nchw.dtype)


def batchnorm2d_pallas(x_nchw, gamma, beta):
    """BatchNorm2d forward (training-mode statistics) via Pallas TPU kernels.

    x_nchw: (N, C, H, W);  gamma, beta: (C,).  Returns (N, C, H, W), x dtype.
    """
    N, C, H, W = x_nchw.shape
    HW = H * W
    itemsize = jnp.dtype(x_nchw.dtype).itemsize

    if HW < 128:
        # Lane axis would be mostly padding -> serve with plain XLA instead.
        return _batchnorm2d_xla(x_nchw, gamma, beta)

    # Free reshape (H, W are contiguous in NCHW) -- no XLA transpose copies.
    x3 = x_nchw.reshape(N, C, HW)
    gamma2 = gamma.reshape(C, 1).astype(jnp.float32)
    beta2 = beta.reshape(C, 1).astype(jnp.float32)

    budget, ceiling = _vmem_params()
    per_elem = _per_elem_vmem_bytes(itemsize)

    c_tile = _choose_c_tile(N, C, HW, itemsize, budget)
    if c_tile is not None:
        out3 = _bn_fused(x3, gamma2, beta2, c_tile, per_elem, ceiling)
    else:
        out3 = _bn_split(x3, gamma2, beta2, budget, ceiling, per_elem)
    return out3.reshape(N, C, H, W)


def batchnorm2d_ref(x_nchw, gamma, beta):
    """Pure-JAX reference matching torch.nn.BatchNorm2d (training mode)."""
    xf = x_nchw.astype(jnp.float32)
    mean = jnp.mean(xf, axis=(0, 2, 3), keepdims=True)
    var = jnp.mean((xf - mean) ** 2, axis=(0, 2, 3), keepdims=True)
    g = gamma.reshape(1, -1, 1, 1).astype(jnp.float32)
    b = beta.reshape(1, -1, 1, 1).astype(jnp.float32)
    return ((xf - mean) * jax.lax.rsqrt(var + EPS) * g + b).astype(x_nchw.dtype)


if __name__ == "__main__":
    key = jax.random.PRNGKey(0)
    N, C, H, W = 2, 4, 16, 16  # Norm_layer(channels=4, type='batch')

    x = jax.random.normal(key, (N, C, H, W), dtype=jnp.float32)

    # nn.BatchNorm2d default init: weight (gamma) = 1, bias (beta) = 0.
    gamma = jnp.ones((C,), dtype=jnp.float32)
    beta = jnp.zeros((C,), dtype=jnp.float32)

    out = jax.block_until_ready(batchnorm2d_pallas(x, gamma, beta))
    ref = jax.block_until_ready(batchnorm2d_ref(x, gamma, beta))

    assert out.shape == (N, C, H, W)
    assert jnp.allclose(out, ref, atol=1e-5, rtol=1e-5), "mismatch vs reference"

    print("KERNEL_OK")
</pallas_src>

<mosaic_0001>
module attributes {stable_mosaic.version = 11 : i64} {
  func.func @_bn_fused_kernel(%arg0: i32, %arg1: memref<2x4x256xf32, #tpu.memory_space<vmem>>, %arg2: memref<4x1xf32, #tpu.memory_space<vmem>>, %arg3: memref<4x1xf32, #tpu.memory_space<vmem>>, %arg4: memref<2x4x256xf32, #tpu.memory_space<vmem>>) attributes {dimension_semantics = [#tpu.dimension_semantics<parallel>], iteration_bounds = array<i64: 1>, scalar_prefetch = 0 : i64, scratch_operands = 0 : i64, tpu.core_type = #tpu.core_type<tc>, window_params = [{transform_indices = @transform_0, window_bounds = array<i64: 2, 4, 256>}, {transform_indices = @transform_1, window_bounds = array<i64: 4, 1>}, {transform_indices = @transform_2, window_bounds = array<i64: 4, 1>}, {transform_indices = @transform_3, window_bounds = array<i64: 2, 4, 256>}]} {
    %c0 = arith.constant 0 : index
    %c0_0 = arith.constant 0 : index
    %c0_1 = arith.constant 0 : index
    %0 = vector.load %arg1[%c0, %c0_0, %c0_1] : memref<2x4x256xf32, #tpu.memory_space<vmem>>, vector<2x4x256xf32>
    %cst = arith.constant dense<0.000000e+00> : vector<4xf32>
    %1 = vector.multi_reduction <add>, %0, %cst [0, 2] : vector<2x4x256xf32> to vector<4xf32>
    %2 = vector.shape_cast %1 : vector<4xf32> to vector<1x4x1xf32>
    %3 = arith.mulf %0, %0 : vector<2x4x256xf32>
    %cst_2 = arith.constant dense<0.000000e+00> : vector<4xf32>
    %4 = vector.multi_reduction <add>, %3, %cst_2 [0, 2] : vector<2x4x256xf32> to vector<4xf32>
    %5 = vector.shape_cast %4 : vector<4xf32> to vector<1x4x1xf32>
    %cst_3 = arith.constant 0.001953125 : f32
    %6 = vector.broadcast %cst_3 : f32 to vector<1x4x1xf32>
    %7 = arith.mulf %2, %6 : vector<1x4x1xf32>
    %cst_4 = arith.constant 0.001953125 : f32
    %8 = vector.broadcast %cst_4 : f32 to vector<1x4x1xf32>
    %9 = arith.mulf %5, %8 : vector<1x4x1xf32>
    %10 = arith.mulf %7, %7 : vector<1x4x1xf32>
    %11 = arith.subf %9, %10 : vector<1x4x1xf32>
    %cst_5 = arith.constant 0.000000e+00 : f32
    %12 = vector.broadcast %cst_5 : f32 to vector<1x4x1xf32>
    %13 = arith.maximumf %11, %12 : vector<1x4x1xf32>
    %cst_6 = arith.constant 9.99999974E-6 : f32
    %14 = vector.broadcast %cst_6 : f32 to vector<1x4x1xf32>
    %15 = arith.addf %13, %14 : vector<1x4x1xf32>
    %16 = math.rsqrt %15 : vector<1x4x1xf32>
    %c0_7 = arith.constant 0 : index
    %c0_8 = arith.constant 0 : index
    %17 = vector.load %arg2[%c0_7, %c0_8] : memref<4x1xf32, #tpu.memory_space<vmem>>, vector<4x1xf32>
    %18 = vector.shape_cast %17 : vector<4x1xf32> to vector<1x4x1xf32>
    %19 = arith.mulf %18, %16 : vector<1x4x1xf32>
    %c0_9 = arith.constant 0 : index
    %c0_10 = arith.constant 0 : index
    %20 = vector.load %arg3[%c0_9, %c0_10] : memref<4x1xf32, #tpu.memory_space<vmem>>, vector<4x1xf32>
    %21 = vector.shape_cast %20 : vector<4x1xf32> to vector<1x4x1xf32>
    %22 = arith.mulf %7, %19 : vector<1x4x1xf32>
    %23 = arith.subf %21, %22 : vector<1x4x1xf32>
    %24 = vector.broadcast %19 : vector<1x4x1xf32> to vector<2x4x256xf32>
    %25 = arith.mulf %0, %24 : vector<2x4x256xf32>
    %26 = vector.broadcast %23 : vector<1x4x1xf32> to vector<2x4x256xf32>
    %27 = arith.addf %25, %26 : vector<2x4x256xf32>
    %c0_11 = arith.constant 0 : index
    %c0_12 = arith.constant 0 : index
    %c0_13 = arith.constant 0 : index
    %28 = vector.load %arg4[%c0_11, %c0_12, %c0_13] : memref<2x4x256xf32, #tpu.memory_space<vmem>>, vector<2x4x256xf32>
    tpu.vector_store %arg4[%c0_11, %c0_12, %c0_13], %27 {strides = array<i32>} : memref<2x4x256xf32, #tpu.memory_space<vmem>>, vector<2x4x256xf32>,
    return
  }
  func.func @transform_0(%arg0: i32) -> (i32, i32, i32) {
    %c0_i32 = arith.constant 0 : i32
    %c0_i32_0 = arith.constant 0 : i32
    %c0_i32_1 = arith.constant 0 : i32
    return %c0_i32, %arg0, %c0_i32_0 : i32, i32, i32
  }
  func.func @transform_1(%arg0: i32) -> (i32, i32) {
    %c0_i32 = arith.constant 0 : i32
    %c0_i32_0 = arith.constant 0 : i32
    return %arg0, %c0_i32 : i32, i32
  }
  func.func @transform_2(%arg0: i32) -> (i32, i32) {
    %c0_i32 = arith.constant 0 : i32
    %c0_i32_0 = arith.constant 0 : i32
    return %arg0, %c0_i32 : i32, i32
  }
  func.func @transform_3(%arg0: i32) -> (i32, i32, i32) {
    %c0_i32 = arith.constant 0 : i32
    %c0_i32_0 = arith.constant 0 : i32
    %c0_i32_1 = arith.constant 0 : i32
    return %c0_i32, %arg0, %c0_i32_0 : i32, i32, i32
  }
}

</mosaic_0001>

<bundles_post_ra>
// kernel: tpu_custom_call.1
= control target key start
LH: loop header
LB: loop body
LE: loop exit
PB: predicated region body
PF: predicated region fallthrough
CT: control target
= control target key end

     0   :  { %8 = vsyncpa [#allocation3], 0  ;;  %s270_s0 = inlined_call_operand.hbm [shape: f32[2,4,256], index: 0, kind: input, shape index: {}]   ;;  %s271_s1 = inlined_call_operand.vmem [shape: f32[4,1], index: 1, kind: input, shape index: {}]   ;;  %s272_s2 = inlined_call_operand.vmem [shape: f32[4,1], index: 2, kind: input, shape index: {}]   ;;  %s273_s3 = inlined_call_operand.hbm [shape: f32[2,4,256], index: 3, kind: output, shape index: {}]  }
   0x1   :  { %9 = vsyncpa [#allocation4], 0  ;;  %s14_s14 = sshll.u32 %s270_s0, 4  ;;  %s206_s15 = smov [#allocation2]   ;;  %s15_s14 = int_to_ptr.hbm [resolvable:$true] %s14_s14 }
   0x2   :  { %s16_s16 = sshll.u32 %s206_s15, 4  ;;  %s207_s17 = smov 128   ;;  %s17_s16 = int_to_ptr.vmem [resolvable:$true] %s16_s16 }
   0x3   :  { %s208_s18 = smov 8  }
   0x4   :  { %22 = dma.hbm_to_vmem [thread:$0]  %s15_s14, 256, %s17_s16, [#allocation3], %s207_s17, %s207_s17, %s208_s18  }
   0x5   :  { %202 = dma.done.wait [#allocation3], 256  }
   0x6   :  { %203 = vsyncadd [#allocation3], 4294967040  ;;  %v238_v0 = vld [vmem:[#allocation2] sm:$0xff]  ;;  %v240_v1 = vld [vmem:[#allocation2 + $0x8] sm:$0xff]  ;;  %vm46_vm0 = vcmask 1043456   ;;  %v209_v26 = vmov 0  }
   0x7   :  { %35 = vst [vmem:[#allocation1] ss:$2 sm:$0xff] %v238_v0  ;;  %v56_v2 = vmul.f32 %v238_v0, %v238_v0  ;;  %v57_v3 = vmul.f32 %v240_v1, %v240_v1  ;;  %150 = vset.pattern.permute.xlu1 %v209_v26  ;;  %151 = vset.pattern.permute.xlu0 %v209_v26  ;;  %v96_v41 = vld [vmem:[%s271_s1] sm:$0xf]  ;;  %v210_v47 = vmov 839922192  }
   0x8   :  { %39 = vst [vmem:[#allocation1 + $0x10] ss:$2 sm:$0xff] %v240_v1  ;;  %v98_v45 = vld [vmem:[%s272_s2] sm:$0xf]  ;;  %v106_v48 = vunpack.c.l.s4 %v210_v47  ;;  %s211_s1 = smov [#allocation5]   ;;  %s131_s25 = sshll.u32 %s273_s3, 4  ;;  %s132_s25 = int_to_ptr.hbm [resolvable:$true] %s131_s25 }
   0x9   :  { %s129_s22 = sshll.u32 %s211_s1, 4  ;;  %s130_s22 = int_to_ptr.vmem [resolvable:$true] %s129_s22 }
   0xa   :  { %v107_v50 = vunpack.c.0.s8 %v106_v48 }
   0xe   :  { %v36_v4 = vld.sshfl [vmem:[#allocation1] sm:$0xff pattern:$0x75316420]  ;;  %v37_v5 = vld.sshfl [vmem:[#allocation1 + $0x8] sm:$0xff pattern:$0x75316420] }
   0xf   :  { %v40_v6 = vld.sshfl [vmem:[#allocation1 + $0x10] sm:$0xff pattern:$0x75316420]  ;;  %v41_v7 = vld.sshfl [vmem:[#allocation1 + $0x18] sm:$0xff pattern:$0x75316420] }
  0x10   :  { %v47_v8 = vsel %vm46_vm0, %v36_v4, 0.0  ;;  %v48_v9 = vsel %vm46_vm0, %v37_v5, 0.0  ;;  %v50_v10 = vsel %vm46_vm0, %v40_v6, 0.0  ;;  %60 = vst [vmem:[#allocation1] ss:$2 sm:$0xff] %v56_v2  ;;  %v52_v12 = vsel %vm46_vm0, %v41_v7, 0.0 }
  0x11   :  { %v49_v11 = vadd.f32 %v48_v9, %v47_v8  ;;  %64 = vst [vmem:[#allocation1 + $0x10] ss:$2 sm:$0xff] %v57_v3 }
  0x13   :  { %v51_v13 = vadd.f32 %v50_v10, %v49_v11 }
  0x15   :  { %v53_v14 = vadd.f32 %v52_v12, %v51_v13 }
  0x17   :  { %54 = vadd.xlane.f32.xlu0 %v53_v14  ;;  %v61_v15 = vld.sshfl [vmem:[#allocation1] sm:$0xff pattern:$0x75316420]  ;;  %v62_v16 = vld.sshfl [vmem:[#allocation1 + $0x8] sm:$0xff pattern:$0x75316420] }
  0x18   :  { %v65_v17 = vld.sshfl [vmem:[#allocation1 + $0x10] sm:$0xff pattern:$0x75316420]  ;;  %v66_v18 = vld.sshfl [vmem:[#allocation1 + $0x18] sm:$0xff pattern:$0x75316420] }
  0x19   :  { %v71_v19 = vsel %vm46_vm0, %v61_v15, 0.0  ;;  %v72_v20 = vsel %vm46_vm0, %v62_v16, 0.0  ;;  %v74_v21 = vsel %vm46_vm0, %v65_v17, 0.0  ;;  %v76_v23 = vsel %vm46_vm0, %v66_v18, 0.0 }
  0x1a   :  { %v73_v22 = vadd.f32 %v72_v20, %v71_v19 }
  0x1c   :  { %v75_v24 = vadd.f32 %v74_v21, %v73_v22 }
  0x1e   :  { %v77_v25 = vadd.f32 %v76_v23, %v75_v24 }
  0x20   :  { %78 = vadd.xlane.f32.xlu0 %v77_v25 }
  0x8a   :  { %v55_v27 = vpop.xlane.xlu0 %54 }
  0x8b   :  { %v80_v28 = vmul.f32 0.001953125, %v55_v27 }
  0x8d   :  { %v82_v30 = vmul.f32 %v80_v28, %v80_v28 }
  0x93   :  { %v79_v29 = vpop.xlane.xlu0 %78 }
  0x94   :  { %v81_v31 = vmul.f32 0.001953125, %v79_v29 }
  0x96   :  { %v83_v32 = vsub.f32 %v81_v31, %v82_v30 }
  0x98   :  { %v84_v33 = vmax.f32 %v83_v32, 0.0 }
  0x9a   :  { %v85_v34 = vadd.f32 1e-05, %v84_v33 }
  0x9c   :  { %152 = vrsqrt.f32 %v85_v34  ;;  %vm92_vm2 = vweird.f32 %v85_v34 }
  0xa2   :  { %v153_v35 = vpop.eup %152 }
  0xa3   :  { %v87_v36 = vmul.f32 %v153_v35, %v85_v34  ;;  %vm93_vm1 = vweird.f32 %v153_v35 }
  0xa4   :  { %vm94_vm3 = vmor %vm92_vm2, %vm93_vm1 }
  0xa5   :  { %v88_v37 = vmul.f32 %v153_v35, %v87_v36 }
  0xa7   :  { %v89_v38 = vmul.f32 0.5, %v88_v37 }
  0xa9   :  { %v90_v39 = vsub.f32 1.5, %v89_v38 }
  0xab   :  { %v91_v40 = vmul.f32 %v153_v35, %v90_v39 }
  0xad   :  { %v95_v42 = vsel %vm94_vm3, %v153_v35, %v91_v40 }
  0xae   :  { %v97_v43 = vmul.f32 %v96_v41, %v95_v42 }
  0xb0   :  { %103 = vperm.xlu1 %150, %v97_v43   ;;  %v99_v44 = vmul.f32 %v97_v43, %v80_v28 }
  0xb2   :  { %v100_v46 = vsub.f32 %v98_v45, %v99_v44 }
  0xb8   :  { %114 = vperm.xlu1 %150, %v100_v46  }
 0x122   :  { %v104_v49 = vpop.permute.xlu1 %103 }
 0x123   :  { %v108_v51 = vperm.slane %v104_v49, %v107_v50 }
 0x125   :  { %v110_v53 = vmul.f32 %v108_v51, %v238_v0  ;;  %v111_v54 = vmul.f32 %v108_v51, %v240_v1 }
 0x12a   :  { %v115_v52 = vpop.permute.xlu1 %114 }
 0x12b   :  { %v119_v55 = vperm.slane %v115_v52, %v107_v50 }
 0x12d   :  { %v121_v56 = vadd.f32 %v119_v55, %v110_v53  ;;  %v122_v57 = vadd.f32 %v119_v55, %v111_v54 }
 0x12f   :  { %123 = vst [vmem:[#allocation5] sm:$0xff] %v121_v56 }
 0x130   :  { %124 = vst [vmem:[#allocation5 + $0x8] sm:$0xff] %v122_v57 }
 0x131   :  { %137 = dma.vmem_to_hbm [thread:$0]  %s130_s22, 256, %s132_s25, [#allocation4], %s207_s17, %s207_s17, %s208_s18  }
 0x132   :  { %204 = dma.done.wait [#allocation4], 256  }
 0x133   :  { %205 = vsyncadd [#allocation4], 4294967040 }
 0x134   :  { %142 = vsyncpa [#allocation3], 1 }
 0x135   :  { %143 = vsyncpa [#allocation4], 1 }

</bundles_post_ra>
